<compile_context>
chip_gen: v5e
topology: v5e:2x2
jax: 0.10.0
libtpu: 0.0.40
codegen_flags: <defaults>
</compile_context>

<pallas_src>
from functools import partial

import jax
import jax.numpy as jnp
from jax.experimental import pallas as pl
from jax.experimental.pallas import tpu as pltpu

_VALUE_COL = 9          # column of the fused head output holding the value
_HEAD_WIDTH = 16        # 9 policy + 1 value + 6 zero-pad lanes
_IN_PAD = 16            # input features padded 9 -> 16
_TB_MIN = 256           # smallest tile worth a dedicated grid step


def _round_up(n, m):
    return ((n + m - 1) // m) * m


def _choose_tb(B, batch_tile):
    """Pick the batch tile: big enough to amortize ~0.35us/step, but with
    >= 2 grid steps whenever each half still has >= _TB_MIN rows (so the
    'parallel' batch axis can split across v7x's two TensorCores)."""
    B8 = _round_up(max(B, 1), 8)
    TB = min(_round_up(batch_tile, 8), B8)
    if TB >= B8 and B8 // 2 >= _TB_MIN:
        TB = _round_up(pl.cdiv(B8, 2), 8)
    return TB


def _tictactoe_kernel(
    x_ref,
    w1_ref, b1_ref,
    w2_ref, b2_ref,
    w3_ref, b3_ref,
    w4_ref, b4_ref,
    wh_ref, bh_ref,
    vmask_ref,
    out_ref,
):
    # Compute dtype for MXU operands (f32 path or bf16 fast path). Biases,
    # ReLU, tanh and the accumulation stay in f32 on every path.
    cdt = w1_ref.dtype

    # Backbone: 4 x (Linear -> ReLU), all on the MXU with f32 accumulation.
    h = x_ref[...].astype(cdt)
    h = jnp.maximum(
        jnp.dot(h, w1_ref[...], preferred_element_type=jnp.float32) + b1_ref[...], 0.0)
    h = jnp.maximum(
        jnp.dot(h.astype(cdt), w2_ref[...], preferred_element_type=jnp.float32) + b2_ref[...], 0.0)
    h = jnp.maximum(
        jnp.dot(h.astype(cdt), w3_ref[...], preferred_element_type=jnp.float32) + b3_ref[...], 0.0)
    h = jnp.maximum(
        jnp.dot(h.astype(cdt), w4_ref[...], preferred_element_type=jnp.float32) + b4_ref[...], 0.0)

    # Fused heads: one matmul, one lane-friendly store.  tanh only matters on
    # the value column; computing it everywhere rides the otherwise-idle EUP
    # slot and the precomputed (1, 16) mask blends it in on the VPU.
    heads = jnp.dot(h.astype(cdt), wh_ref[...],
                    preferred_element_type=jnp.float32) + bh_ref[...]
    m = vmask_ref[...]                       # (1, 16): 1.0 at the value column
    heads = heads + m * (jnp.tanh(heads) - heads)

    out_ref[...] = heads.astype(out_ref.dtype)


def prepare_params(params, *, use_bf16=False):
    """One-time parameter layout plumbing (hoisted out of the per-call path).

    Pads w1's K dim 9 -> 16, fuses the policy/value heads into one (64, 16)
    weight + (1, 16) bias, builds the (1, 16) value-column mask, and
    optionally casts the weights to bf16 (biases stay f32)."""
    (w1, b1, w2, b2, w3, b3, w4, b4, wp, bp, wv, bv) = params
    wdt = jnp.bfloat16 if use_bf16 else jnp.float32

    w1p = jnp.pad(w1.astype(jnp.float32),
                  ((0, _IN_PAD - w1.shape[0]), (0, 0))).astype(wdt)

    wh = (jnp.zeros((w4.shape[1], _HEAD_WIDTH), jnp.float32)
          .at[:, :9].set(wp)
          .at[:, _VALUE_COL:_VALUE_COL + 1].set(wv)).astype(wdt)
    bh = (jnp.zeros((1, _HEAD_WIDTH), jnp.float32)
          .at[:, :9].set(bp)
          .at[:, _VALUE_COL:_VALUE_COL + 1].set(bv))
    vmask = jnp.zeros((1, _HEAD_WIDTH), jnp.float32).at[:, _VALUE_COL].set(1.0)

    return (w1p, b1.astype(jnp.float32),
            w2.astype(wdt), b2.astype(jnp.float32),
            w3.astype(wdt), b3.astype(jnp.float32),
            w4.astype(wdt), b4.astype(jnp.float32),
            wh, bh, vmask)


@partial(jax.jit, static_argnames=("batch_tile",))
def tictactoe_net_forward(x, prepared, batch_tile=2048):
    """TicTacToeNet forward. x: (B, 9) -> (policy (B, 9), value (B, 1))."""
    (w1p, b1, w2, b2, w3, b3, w4, b4, wh, bh, vmask) = prepared
    B = x.shape[0]

    # Pad input features 9 -> 16 (numerically inert) and tile the batch.
    x16 = jnp.pad(x.astype(jnp.float32), ((0, 0), (0, _IN_PAD - x.shape[1])))
    TB = _choose_tb(B, batch_tile)
    B_pad = _round_up(B, TB)
    if B_pad != B:
        x16 = jnp.pad(x16, ((0, B_pad - B), (0, 0)))
    grid = (B_pad // TB,)

    batched = lambda i: (i, 0)     # x / output: march over batch tiles
    resident = lambda i: (0, 0)    # weights / biases / mask: same block

    out = pl.pallas_call(
        _tictactoe_kernel,
        out_shape=jax.ShapeDtypeStruct((B_pad, _HEAD_WIDTH), jnp.float32),
        grid=grid,
        in_specs=[
            pl.BlockSpec((TB, _IN_PAD), batched),
            pl.BlockSpec(w1p.shape, resident),
            pl.BlockSpec(b1.shape, resident),
            pl.BlockSpec(w2.shape, resident),
            pl.BlockSpec(b2.shape, resident),
            pl.BlockSpec(w3.shape, resident),
            pl.BlockSpec(b3.shape, resident),
            pl.BlockSpec(w4.shape, resident),
            pl.BlockSpec(b4.shape, resident),
            pl.BlockSpec(wh.shape, resident),
            pl.BlockSpec(bh.shape, resident),
            pl.BlockSpec(vmask.shape, resident),
        ],
        out_specs=pl.BlockSpec((TB, _HEAD_WIDTH), batched),
        compiler_params=pltpu.CompilerParams(
            # "parallel" + guaranteed grid>=2 lets v7x megacore split the
            # batch axis; it is a no-op on single-TC v5e/v6e.
            dimension_semantics=("parallel",),
            # 32 MiB is safe on every generation (v7x has only 64 MiB VMEM).
            vmem_limit_bytes=32 * 1024 * 1024,
        ),
    )(x16, w1p, b1, w2, b2, w3, b3, w4, b4, wh, bh, vmask)

    policy = out[:B, :9]
    value = out[:B, _VALUE_COL:_VALUE_COL + 1]
    return policy, value


def init_params(key):
    """Deterministic parameter init matching nn.Linear shapes.

    PyTorch stores Linear weights as (out, in); we store them transposed
    (in, out) so the kernel can do x @ W directly. Biases are (1, out)."""
    dims = [(9, 128), (128, 128), (128, 128), (128, 64), (64, 9), (64, 1)]
    params = []
    for fan_in, fan_out in dims:
        kw, kb, key = jax.random.split(key, 3)
        bound = 1.0 / jnp.sqrt(fan_in)
        w = jax.random.uniform(
            kw, (fan_in, fan_out), jnp.float32, minval=-bound, maxval=bound)
        b = jax.random.uniform(
            kb, (1, fan_out), jnp.float32, minval=-bound, maxval=bound)
        params.extend([w, b])
    return tuple(params)


def reference_forward(x, params):
    """Plain-JAX reference (mirrors the PyTorch forward exactly)."""
    (w1, b1, w2, b2, w3, b3, w4, b4, wp, bp, wv, bv) = params
    h = jnp.maximum(x @ w1 + b1, 0.0)
    h = jnp.maximum(h @ w2 + b2, 0.0)
    h = jnp.maximum(h @ w3 + b3, 0.0)
    h = jnp.maximum(h @ w4 + b4, 0.0)
    return h @ wp + bp, jnp.tanh(h @ wv + bv)


if __name__ == "__main__":
    key = jax.random.PRNGKey(0)
    kx, kp = jax.random.split(key)

    params = init_params(kp)
    prepared_f32 = prepare_params(params)                 # f32 (exact) path
    prepared_bf16 = prepare_params(params, use_bf16=True)  # bf16 fast path

    # Small batch (single-tile path), exact f32.
    B = 8
    x = jax.random.uniform(kx, (B, 9), jnp.float32, minval=-1.0, maxval=1.0)
    policy, value = tictactoe_net_forward(x, prepared_f32)
    jax.block_until_ready((policy, value))
    ref_policy, ref_value = reference_forward(x, params)
    assert policy.shape == (B, 9) and value.shape == (B, 1)
    assert jnp.allclose(policy, ref_policy, atol=1e-5, rtol=1e-5)
    assert jnp.allclose(value, ref_value, atol=1e-5, rtol=1e-5)

    # Batch not a tile multiple: exercises padding + the >=2-grid-step split.
    B2 = 1037
    x2 = jax.random.uniform(jax.random.PRNGKey(1), (B2, 9), jnp.float32,
                            minval=-1.0, maxval=1.0)
    p2, v2 = tictactoe_net_forward(x2, prepared_f32)
    jax.block_until_ready((p2, v2))
    rp2, rv2 = reference_forward(x2, params)
    assert p2.shape == (B2, 9) and v2.shape == (B2, 1)
    assert jnp.allclose(p2, rp2, atol=1e-5, rtol=1e-5)
    assert jnp.allclose(v2, rv2, atol=1e-5, rtol=1e-5)

    # bf16 fast path (bf16 MXU operands, f32 accumulation + elementwise):
    # relaxed tolerance vs. the f32 reference.
    p3, v3 = tictactoe_net_forward(x2, prepared_bf16)
    jax.block_until_ready((p3, v3))
    assert p3.shape == (B2, 9) and v3.shape == (B2, 1)
    assert jnp.allclose(p3, rp2, atol=3e-2, rtol=3e-2)
    assert jnp.allclose(v3, rv2, atol=3e-2, rtol=3e-2)

    print("KERNEL_OK")
</pallas_src>

<mosaic_0001>
module attributes {stable_mosaic.version = 11 : i64} {
  func.func @_tictactoe_kernel(%arg0: i32, %arg1: memref<8x16xf32, #tpu.memory_space<vmem>>, %arg2: memref<16x128xf32, #tpu.memory_space<vmem>>, %arg3: memref<1x128xf32, #tpu.memory_space<vmem>>, %arg4: memref<128x128xf32, #tpu.memory_space<vmem>>, %arg5: memref<1x128xf32, #tpu.memory_space<vmem>>, %arg6: memref<128x128xf32, #tpu.memory_space<vmem>>, %arg7: memref<1x128xf32, #tpu.memory_space<vmem>>, %arg8: memref<128x64xf32, #tpu.memory_space<vmem>>, %arg9: memref<1x64xf32, #tpu.memory_space<vmem>>, %arg10: memref<64x16xf32, #tpu.memory_space<vmem>>, %arg11: memref<1x16xf32, #tpu.memory_space<vmem>>, %arg12: memref<1x16xf32, #tpu.memory_space<vmem>>, %arg13: memref<8x16xf32, #tpu.memory_space<vmem>>) attributes {dimension_semantics = [#tpu.dimension_semantics<parallel>], iteration_bounds = array<i64: 1>, scalar_prefetch = 0 : i64, scratch_operands = 0 : i64, tpu.core_type = #tpu.core_type<tc>, window_params = [{transform_indices = @transform_0, window_bounds = array<i64: 8, 16>}, {pipeline_mode = #tpu.pipeline_mode<synchronous>, transform_indices = @transform_1, window_bounds = array<i64: 16, 128>}, {pipeline_mode = #tpu.pipeline_mode<synchronous>, transform_indices = @transform_2, window_bounds = array<i64: 1, 128>}, {pipeline_mode = #tpu.pipeline_mode<synchronous>, transform_indices = @transform_3, window_bounds = array<i64: 128, 128>}, {pipeline_mode = #tpu.pipeline_mode<synchronous>, transform_indices = @transform_4, window_bounds = array<i64: 1, 128>}, {pipeline_mode = #tpu.pipeline_mode<synchronous>, transform_indices = @transform_5, window_bounds = array<i64: 128, 128>}, {pipeline_mode = #tpu.pipeline_mode<synchronous>, transform_indices = @transform_6, window_bounds = array<i64: 1, 128>}, {pipeline_mode = #tpu.pipeline_mode<synchronous>, transform_indices = @transform_7, window_bounds = array<i64: 128, 64>}, {pipeline_mode = #tpu.pipeline_mode<synchronous>, transform_indices = @transform_8, window_bounds = array<i64: 1, 64>}, {pipeline_mode = #tpu.pipeline_mode<synchronous>, transform_indices = @transform_9, window_bounds = array<i64: 64, 16>}, {pipeline_mode = #tpu.pipeline_mode<synchronous>, transform_indices = @transform_10, window_bounds = array<i64: 1, 16>}, {pipeline_mode = #tpu.pipeline_mode<synchronous>, transform_indices = @transform_11, window_bounds = array<i64: 1, 16>}, {transform_indices = @transform_12, window_bounds = array<i64: 8, 16>}]} {
    %c0 = arith.constant 0 : index
    %c0_0 = arith.constant 0 : index
    %0 = vector.load %arg1[%c0, %c0_0] : memref<8x16xf32, #tpu.memory_space<vmem>>, vector<8x16xf32>
    %c0_1 = arith.constant 0 : index
    %c0_2 = arith.constant 0 : index
    %1 = vector.load %arg2[%c0_1, %c0_2] : memref<16x128xf32, #tpu.memory_space<vmem>>, vector<16x128xf32>
    %cst = arith.constant dense<0.000000e+00> : vector<8x128xf32>
    %2 = tpu.matmul %0, %1, %cst {dimension_numbers = #tpu.dot_dimension_numbers<[1], [0], [0], [1], [0, 0, 1, 1], [], []>} : vector<8x16xf32>, vector<16x128xf32>, vector<8x128xf32> -> vector<8x128xf32>
    %c0_3 = arith.constant 0 : index
    %c0_4 = arith.constant 0 : index
    %3 = vector.load %arg3[%c0_3, %c0_4] : memref<1x128xf32, #tpu.memory_space<vmem>>, vector<1x128xf32>
    %4 = vector.broadcast %3 : vector<1x128xf32> to vector<8x128xf32>
    %5 = arith.addf %2, %4 : vector<8x128xf32>
    %cst_5 = arith.constant 0.000000e+00 : f32
    %6 = vector.broadcast %cst_5 : f32 to vector<8x128xf32>
    %7 = arith.maximumf %5, %6 : vector<8x128xf32>
    %c0_6 = arith.constant 0 : index
    %c0_7 = arith.constant 0 : index
    %8 = vector.load %arg4[%c0_6, %c0_7] : memref<128x128xf32, #tpu.memory_space<vmem>>, vector<128x128xf32>
    %cst_8 = arith.constant dense<0.000000e+00> : vector<8x128xf32>
    %9 = tpu.matmul %7, %8, %cst_8 {dimension_numbers = #tpu.dot_dimension_numbers<[1], [0], [0], [1], [0, 0, 1, 1], [], []>} : vector<8x128xf32>, vector<128x128xf32>, vector<8x128xf32> -> vector<8x128xf32>
    %c0_9 = arith.constant 0 : index
    %c0_10 = arith.constant 0 : index
    %10 = vector.load %arg5[%c0_9, %c0_10] : memref<1x128xf32, #tpu.memory_space<vmem>>, vector<1x128xf32>
    %11 = vector.broadcast %10 : vector<1x128xf32> to vector<8x128xf32>
    %12 = arith.addf %9, %11 : vector<8x128xf32>
    %cst_11 = arith.constant 0.000000e+00 : f32
    %13 = vector.broadcast %cst_11 : f32 to vector<8x128xf32>
    %14 = arith.maximumf %12, %13 : vector<8x128xf32>
    %c0_12 = arith.constant 0 : index
    %c0_13 = arith.constant 0 : index
    %15 = vector.load %arg6[%c0_12, %c0_13] : memref<128x128xf32, #tpu.memory_space<vmem>>, vector<128x128xf32>
    %cst_14 = arith.constant dense<0.000000e+00> : vector<8x128xf32>
    %16 = tpu.matmul %14, %15, %cst_14 {dimension_numbers = #tpu.dot_dimension_numbers<[1], [0], [0], [1], [0, 0, 1, 1], [], []>} : vector<8x128xf32>, vector<128x128xf32>, vector<8x128xf32> -> vector<8x128xf32>
    %c0_15 = arith.constant 0 : index
    %c0_16 = arith.constant 0 : index
    %17 = vector.load %arg7[%c0_15, %c0_16] : memref<1x128xf32, #tpu.memory_space<vmem>>, vector<1x128xf32>
    %18 = vector.broadcast %17 : vector<1x128xf32> to vector<8x128xf32>
    %19 = arith.addf %16, %18 : vector<8x128xf32>
    %cst_17 = arith.constant 0.000000e+00 : f32
    %20 = vector.broadcast %cst_17 : f32 to vector<8x128xf32>
    %21 = arith.maximumf %19, %20 : vector<8x128xf32>
    %c0_18 = arith.constant 0 : index
    %c0_19 = arith.constant 0 : index
    %22 = vector.load %arg8[%c0_18, %c0_19] : memref<128x64xf32, #tpu.memory_space<vmem>>, vector<128x64xf32>
    %cst_20 = arith.constant dense<0.000000e+00> : vector<8x64xf32>
    %23 = tpu.matmul %21, %22, %cst_20 {dimension_numbers = #tpu.dot_dimension_numbers<[1], [0], [0], [1], [0, 0, 1, 1], [], []>} : vector<8x128xf32>, vector<128x64xf32>, vector<8x64xf32> -> vector<8x64xf32>
    %c0_21 = arith.constant 0 : index
    %c0_22 = arith.constant 0 : index
    %24 = vector.load %arg9[%c0_21, %c0_22] : memref<1x64xf32, #tpu.memory_space<vmem>>, vector<1x64xf32>
    %25 = vector.broadcast %24 : vector<1x64xf32> to vector<8x64xf32>
    %26 = arith.addf %23, %25 : vector<8x64xf32>
    %cst_23 = arith.constant 0.000000e+00 : f32
    %27 = vector.broadcast %cst_23 : f32 to vector<8x64xf32>
    %28 = arith.maximumf %26, %27 : vector<8x64xf32>
    %c0_24 = arith.constant 0 : index
    %c0_25 = arith.constant 0 : index
    %29 = vector.load %arg10[%c0_24, %c0_25] : memref<64x16xf32, #tpu.memory_space<vmem>>, vector<64x16xf32>
    %cst_26 = arith.constant dense<0.000000e+00> : vector<8x16xf32>
    %30 = tpu.matmul %28, %29, %cst_26 {dimension_numbers = #tpu.dot_dimension_numbers<[1], [0], [0], [1], [0, 0, 1, 1], [], []>} : vector<8x64xf32>, vector<64x16xf32>, vector<8x16xf32> -> vector<8x16xf32>
    %c0_27 = arith.constant 0 : index
    %c0_28 = arith.constant 0 : index
    %31 = vector.load %arg11[%c0_27, %c0_28] : memref<1x16xf32, #tpu.memory_space<vmem>>, vector<1x16xf32>
    %32 = vector.broadcast %31 : vector<1x16xf32> to vector<8x16xf32>
    %33 = arith.addf %30, %32 : vector<8x16xf32>
    %c0_29 = arith.constant 0 : index
    %c0_30 = arith.constant 0 : index
    %34 = vector.load %arg12[%c0_29, %c0_30] : memref<1x16xf32, #tpu.memory_space<vmem>>, vector<1x16xf32>
    %35 = math.tanh %33 : vector<8x16xf32>
    %36 = arith.subf %35, %33 : vector<8x16xf32>
    %37 = vector.broadcast %34 : vector<1x16xf32> to vector<8x16xf32>
    %38 = arith.mulf %37, %36 : vector<8x16xf32>
    %39 = arith.addf %33, %38 : vector<8x16xf32>
    %c0_31 = arith.constant 0 : index
    %c0_32 = arith.constant 0 : index
    %40 = vector.load %arg13[%c0_31, %c0_32] : memref<8x16xf32, #tpu.memory_space<vmem>>, vector<8x16xf32>
    tpu.vector_store %arg13[%c0_31, %c0_32], %39 {strides = array<i32>} : memref<8x16xf32, #tpu.memory_space<vmem>>, vector<8x16xf32>,
    return
  }
  func.func @transform_0(%arg0: i32) -> (i32, i32) {
    %c0_i32 = arith.constant 0 : i32
    %c0_i32_0 = arith.constant 0 : i32
    return %arg0, %c0_i32 : i32, i32
  }
  func.func @transform_1(%arg0: i32) -> (i32, i32) {
    %c0_i32 = arith.constant 0 : i32
    %c0_i32_0 = arith.constant 0 : i32
    %c0_i32_1 = arith.constant 0 : i32
    return %c0_i32, %c0_i32_0 : i32, i32
  }
  func.func @transform_2(%arg0: i32) -> (i32, i32) {
    %c0_i32 = arith.constant 0 : i32
    %c0_i32_0 = arith.constant 0 : i32
    %c0_i32_1 = arith.constant 0 : i32
    return %c0_i32, %c0_i32_0 : i32, i32
  }
  func.func @transform_3(%arg0: i32) -> (i32, i32) {
    %c0_i32 = arith.constant 0 : i32
    %c0_i32_0 = arith.constant 0 : i32
    %c0_i32_1 = arith.constant 0 : i32
    return %c0_i32, %c0_i32_0 : i32, i32
  }
  func.func @transform_4(%arg0: i32) -> (i32, i32) {
    %c0_i32 = arith.constant 0 : i32
    %c0_i32_0 = arith.constant 0 : i32
    %c0_i32_1 = arith.constant 0 : i32
    return %c0_i32, %c0_i32_0 : i32, i32
  }
  func.func @transform_5(%arg0: i32) -> (i32, i32) {
    %c0_i32 = arith.constant 0 : i32
    %c0_i32_0 = arith.constant 0 : i32
    %c0_i32_1 = arith.constant 0 : i32
    return %c0_i32, %c0_i32_0 : i32, i32
  }
  func.func @transform_6(%arg0: i32) -> (i32, i32) {
    %c0_i32 = arith.constant 0 : i32
    %c0_i32_0 = arith.constant 0 : i32
    %c0_i32_1 = arith.constant 0 : i32
    return %c0_i32, %c0_i32_0 : i32, i32
  }
  func.func @transform_7(%arg0: i32) -> (i32, i32) {
    %c0_i32 = arith.constant 0 : i32
    %c0_i32_0 = arith.constant 0 : i32
    %c0_i32_1 = arith.constant 0 : i32
    return %c0_i32, %c0_i32_0 : i32, i32
  }
  func.func @transform_8(%arg0: i32) -> (i32, i32) {
    %c0_i32 = arith.constant 0 : i32
    %c0_i32_0 = arith.constant 0 : i32
    %c0_i32_1 = arith.constant 0 : i32
    return %c0_i32, %c0_i32_0 : i32, i32
  }
  func.func @transform_9(%arg0: i32) -> (i32, i32) {
    %c0_i32 = arith.constant 0 : i32
    %c0_i32_0 = arith.constant 0 : i32
    %c0_i32_1 = arith.constant 0 : i32
    return %c0_i32, %c0_i32_0 : i32, i32
  }
  func.func @transform_10(%arg0: i32) -> (i32, i32) {
    %c0_i32 = arith.constant 0 : i32
    %c0_i32_0 = arith.constant 0 : i32
    %c0_i32_1 = arith.constant 0 : i32
    return %c0_i32, %c0_i32_0 : i32, i32
  }
  func.func @transform_11(%arg0: i32) -> (i32, i32) {
    %c0_i32 = arith.constant 0 : i32
    %c0_i32_0 = arith.constant 0 : i32
    %c0_i32_1 = arith.constant 0 : i32
    return %c0_i32, %c0_i32_0 : i32, i32
  }
  func.func @transform_12(%arg0: i32) -> (i32, i32) {
    %c0_i32 = arith.constant 0 : i32
    %c0_i32_0 = arith.constant 0 : i32
    return %arg0, %c0_i32 : i32, i32
  }
}

</mosaic_0001>

<bundles_post_ra>
// kernel: tictactoe_net_forward.1
= control target key start
LH: loop header
LB: loop body
LE: loop exit
PB: predicated region body
PF: predicated region fallthrough
CT: control target
= control target key end

     0   :  { %17 = vsyncpa [#allocation3], 0  ;;  %s301_s24 = smov [#allocation2]   ;;  %s302_s26 = smov 128   ;;  %s524_s0 = inlined_call_operand.vmem [shape: f32[8,16], index: 0, kind: input, shape index: {}]   ;;  %s525_s1 = inlined_call_operand.vmem [shape: f32[16,128], index: 1, kind: input, shape index: {}]   ;;  %s526_s2 = inlined_call_operand.vmem [shape: f32[1,128], index: 2, kind: input, shape index: {}]   ;;  %s527_s3 = inlined_call_operand.vmem [shape: f32[128,128], index: 3, kind: input, shape index: {}]   ;;  %s528_s4 = inlined_call_operand.vmem [shape: f32[1,128], index: 4, kind: input, shape index: {}]   ;;  %s529_s5 = inlined_call_operand.hbm [shape: f32[128,128], index: 5, kind: input, shape index: {}]   ;;  %s530_s6 = inlined_call_operand.vmem [shape: f32[1,128], index: 6, kind: input, shape index: {}]   ;;  %s531_s7 = inlined_call_operand.vmem [shape: f32[128,64], index: 7, kind: input, shape index: {}]   ;;  %s532_s8 = inlined_call_operand.vmem [shape: f32[1,64], index: 8, kind: input, shape index: {}]   ;;  %s533_s9 = inlined_call_operand.vmem [shape: f32[64,16], index: 9, kind: input, shape index: {}]   ;;  %s534_s10 = inlined_call_operand.vmem [shape: f32[1,16], index: 10, kind: input, shape index: {}]   ;;  %s535_s11 = inlined_call_operand.vmem [shape: f32[1,16], index: 11, kind: input, shape index: {}]   ;;  %s536_s12 = inlined_call_operand.vmem [shape: f32[8,16], index: 12, kind: output, shape index: {}]  }
   0x1   :  { %s32_s23 = sshll.u32 %s529_s5, 4  ;;  %s34_s25 = sshll.u32 %s301_s24, 4  ;;  %s33_s23 = int_to_ptr.hbm [resolvable:$true] %s32_s23  ;;  %s35_s25 = int_to_ptr.vmem [resolvable:$true] %s34_s25 }
   0x2   :  { %s303_s27 = smov 8  }
   0x3   :  { %40 = dma.hbm_to_vmem [thread:$0]  %s33_s23, 2048, %s35_s25, [#allocation3], %s302_s26, %s302_s26, %s303_s27  }
   0x4   :  { %299 = dma.done.wait [#allocation3], 2048  }
   0x5   :  { %300 = vsyncadd [#allocation3], 4294965248  ;;  %v59_v0 = vld [vmem:[%s525_s1 + $0x8] sm:$0xff]  ;;  %v58_v1 = vld [vmem:[%s525_s1] sm:$0xff]  ;;  %vm64_vm0 = vcmask 130048   ;;  %vm224_vm1 = vcmask 523264  }
   0x6   :  { %82 = vmatpush.msra.mxu0 %v59_v0  ;;  %v57_v2 = vld [vmem:[%s524_s0] sm:$0xff]  ;;  %v104_v3 = vld [vmem:[%s527_s3 + $0x78] sm:$0xff]  ;;  %v103_v4 = vld [vmem:[%s527_s3 + $0x70] sm:$0xff] }
   0x7   :  { %109 = vmatpush.msra.mxu1 %v104_v3  ;;  %v102_v5 = vld [vmem:[%s527_s3 + $0x68] sm:$0xff]  ;;  %v101_v6 = vld [vmem:[%s527_s3 + $0x60] sm:$0xff]  ;;  %v100_v7 = vld [vmem:[%s527_s3 + $0x58] sm:$0xff] }
   0x8   :  { %83 = vmatpush.msra.mxu0 %v58_v1  ;;  %v99_v8 = vld [vmem:[%s527_s3 + $0x50] sm:$0xff]  ;;  %v98_v9 = vld [vmem:[%s527_s3 + $0x48] sm:$0xff]  ;;  %v97_v10 = vld [vmem:[%s527_s3 + $0x40] sm:$0xff] }
   0x9   :  { %262 = vmatmul.msk.f32.vlgmr.msra.gmra.mxu0 %vm64_vm0, %v57_v2  ;;  %110 = vmatpush.msra.mxu1 %v103_v4  ;;  %v96_v11 = vld [vmem:[%s527_s3 + $0x38] sm:$0xff]  ;;  %v95_v12 = vld [vmem:[%s527_s3 + $0x30] sm:$0xff]  ;;  %v94_v13 = vld [vmem:[%s527_s3 + $0x28] sm:$0xff] }
   0xa   :  { %v93_v14 = vld [vmem:[%s527_s3 + $0x20] sm:$0xff]  ;;  %v92_v15 = vld [vmem:[%s527_s3 + $0x18] sm:$0xff]  ;;  %v91_v16 = vld [vmem:[%s527_s3 + $0x10] sm:$0xff] }
   0xb   :  { %111 = vmatpush.msra.mxu1 %v102_v5  ;;  %v90_v17 = vld [vmem:[%s527_s3 + $0x8] sm:$0xff]  ;;  %v89_v18 = vld [vmem:[%s527_s3] sm:$0xff]  ;;  %v145_v19 = vld [vmem:[#allocation2 + $0x78] sm:$0xff] }
   0xc   :  { %v144_v20 = vld [vmem:[#allocation2 + $0x70] sm:$0xff]  ;;  %150 = vmatpush.msra.mxu2 %v145_v19  ;;  %v143_v21 = vld [vmem:[#allocation2 + $0x68] sm:$0xff]  ;;  %v142_v22 = vld [vmem:[#allocation2 + $0x60] sm:$0xff] }
   0xd   :  { %112 = vmatpush.msra.mxu1 %v101_v6  ;;  %v141_v23 = vld [vmem:[#allocation2 + $0x58] sm:$0xff]  ;;  %v140_v24 = vld [vmem:[#allocation2 + $0x50] sm:$0xff]  ;;  %v139_v25 = vld [vmem:[#allocation2 + $0x48] sm:$0xff] }
   0xe   :  { %151 = vmatpush.msra.mxu2 %v144_v20  ;;  %v138_v26 = vld [vmem:[#allocation2 + $0x40] sm:$0xff]  ;;  %v137_v27 = vld [vmem:[#allocation2 + $0x38] sm:$0xff]  ;;  %v136_v28 = vld [vmem:[#allocation2 + $0x30] sm:$0xff] }
   0xf   :  { %113 = vmatpush.msra.mxu1 %v100_v7  ;;  %v135_v29 = vld [vmem:[#allocation2 + $0x28] sm:$0xff]  ;;  %v134_v30 = vld [vmem:[#allocation2 + $0x20] sm:$0xff]  ;;  %v133_v31 = vld [vmem:[#allocation2 + $0x18] sm:$0xff] }
  0x10   :  { %152 = vmatpush.msra.mxu2 %v143_v21  ;;  %v267_v32 = vld [vmem:[%s526_s2] ss:$0 sm:$0xff]  ;;  %v132_v36 = vld [vmem:[#allocation2 + $0x10] sm:$0xff]  ;;  %v131_v37 = vld [vmem:[#allocation2 + $0x8] sm:$0xff] }
  0x11   :  { %114 = vmatpush.msra.mxu1 %v99_v8  ;;  %v130_v38 = vld [vmem:[#allocation2] sm:$0xff]  ;;  %v186_v39 = vld [vmem:[%s531_s7 + $0x78] sm:$0xff]  ;;  %v185_v40 = vld [vmem:[%s531_s7 + $0x70] sm:$0xff] }
  0x12   :  { %153 = vmatpush.msra.mxu2 %v142_v22  ;;  %191 = vmatpush.msra.mxu3 %v186_v39  ;;  %v184_v41 = vld [vmem:[%s531_s7 + $0x68] sm:$0xff]  ;;  %v183_v42 = vld [vmem:[%s531_s7 + $0x60] sm:$0xff]  ;;  %v182_v43 = vld [vmem:[%s531_s7 + $0x58] sm:$0xff] }
  0x13   :  { %115 = vmatpush.msra.mxu1 %v98_v9  ;;  %v181_v44 = vld [vmem:[%s531_s7 + $0x50] sm:$0xff]  ;;  %v180_v45 = vld [vmem:[%s531_s7 + $0x48] sm:$0xff]  ;;  %v179_v46 = vld [vmem:[%s531_s7 + $0x40] sm:$0xff] }
  0x14   :  { %154 = vmatpush.msra.mxu2 %v141_v23  ;;  %192 = vmatpush.msra.mxu3 %v185_v40  ;;  %v178_v47 = vld [vmem:[%s531_s7 + $0x38] sm:$0xff]  ;;  %v177_v48 = vld [vmem:[%s531_s7 + $0x30] sm:$0xff]  ;;  %v176_v49 = vld [vmem:[%s531_s7 + $0x28] sm:$0xff] }
  0x15   :  { %116 = vmatpush.msra.mxu1 %v97_v10  ;;  %v175_v50 = vld [vmem:[%s531_s7 + $0x20] sm:$0xff]  ;;  %v174_v51 = vld [vmem:[%s531_s7 + $0x18] sm:$0xff]  ;;  %v173_v56 = vld [vmem:[%s531_s7 + $0x10] sm:$0xff] }
  0x16   :  { %155 = vmatpush.msra.mxu2 %v140_v24  ;;  %193 = vmatpush.msra.mxu3 %v184_v41  ;;  %v268_v52 = vld [vmem:[%s528_s4] ss:$0 sm:$0xff]  ;;  %v172_v57 = vld [vmem:[%s531_s7 + $0x8] sm:$0xff]  ;;  %v219_v59 = vld [vmem:[%s533_s9 + $0x38] sm:$0xff] }
  0x17   :  { %117 = vmatpush.msra.mxu1 %v96_v11  ;;  %v171_v58 = vld [vmem:[%s531_s7] sm:$0xff]  ;;  %v218_v60 = vld [vmem:[%s533_s9 + $0x30] sm:$0xff]  ;;  %236 = vmatpush.msrb.mxu0 %v219_v59  ;;  %v217_v61 = vld [vmem:[%s533_s9 + $0x28] sm:$0xff] }
  0x18   :  { %156 = vmatpush.msra.mxu2 %v139_v25  ;;  %194 = vmatpush.msra.mxu3 %v183_v42  ;;  %v216_v62 = vld [vmem:[%s533_s9 + $0x20] sm:$0xff]  ;;  %v215_v63 = vld [vmem:[%s533_s9 + $0x18] sm:$0xff]  ;;  %v214_v4 = vld [vmem:[%s533_s9 + $0x10] sm:$0xff] }
  0x19   :  { %118 = vmatpush.msra.mxu1 %v95_v12  ;;  %237 = vmatpush.msrb.mxu0 %v218_v60  ;;  %v269_v0 = vld [vmem:[%s530_s6] ss:$0 sm:$0xff]  ;;  %v213_v5 = vld [vmem:[%s533_s9 + $0x8] sm:$0xff] }
  0x1a   :  { %157 = vmatpush.msra.mxu2 %v138_v26  ;;  %195 = vmatpush.msra.mxu3 %v182_v43  ;;  %v212_v6 = vld [vmem:[%s533_s9] sm:$0xff] }
  0x1b   :  { %119 = vmatpush.msra.mxu1 %v94_v13  ;;  %238 = vmatpush.msrb.mxu0 %v217_v61  ;;  %v270_v7 = vld [vmem:[%s532_s8] ss:$0 sm:$0xff] }
  0x1c   :  { %158 = vmatpush.msra.mxu2 %v137_v27  ;;  %196 = vmatpush.msra.mxu3 %v181_v44  ;;  %v271_v11 = vld [vmem:[%s534_s10] ss:$0 sm:$0xff] }
  0x1d   :  { %120 = vmatpush.msra.mxu1 %v93_v14  ;;  %239 = vmatpush.msrb.mxu0 %v216_v62  ;;  %v272_v14 = vld [vmem:[%s535_s11] ss:$0 sm:$0xff] }
  0x1e   :  { %159 = vmatpush.msra.mxu2 %v136_v28  ;;  %197 = vmatpush.msra.mxu3 %v180_v45 }
  0x1f   :  { %121 = vmatpush.msra.mxu1 %v92_v15  ;;  %240 = vmatpush.msrb.mxu0 %v215_v63 }
  0x20   :  { %160 = vmatpush.msra.mxu2 %v135_v29  ;;  %198 = vmatpush.msra.mxu3 %v179_v46 }
  0x21   :  { %122 = vmatpush.msra.mxu1 %v91_v16  ;;  %241 = vmatpush.msrb.mxu0 %v214_v4 }
  0x22   :  { %161 = vmatpush.msra.mxu2 %v134_v30  ;;  %199 = vmatpush.msra.mxu3 %v178_v47 }
  0x23   :  { %123 = vmatpush.msra.mxu1 %v90_v17  ;;  %242 = vmatpush.msrb.mxu0 %v213_v5 }
  0x24   :  { %162 = vmatpush.msra.mxu2 %v133_v31  ;;  %200 = vmatpush.msra.mxu3 %v177_v48 }
  0x25   :  { %124 = vmatpush.msra.mxu1 %v89_v18  ;;  %243 = vmatpush.msrb.mxu0 %v212_v6 }
  0x26   :  { %163 = vmatpush.msra.mxu2 %v132_v36  ;;  %201 = vmatpush.msra.mxu3 %v176_v49 }
  0x28   :  { %164 = vmatpush.msra.mxu2 %v131_v37  ;;  %202 = vmatpush.msra.mxu3 %v175_v50 }
  0x2a   :  { %165 = vmatpush.msra.mxu2 %v130_v38  ;;  %203 = vmatpush.msra.mxu3 %v174_v51 }
  0x2c   :  { %204 = vmatpush.msra.mxu3 %v173_v56 }
  0x2e   :  { %205 = vmatpush.msra.mxu3 %v172_v57 }
  0x30   :  { %206 = vmatpush.msra.mxu3 %v171_v58 }
  0x86   :  { %v85_v33 = vpop.f32.mrf.mxu0 }
  0x87   :  { %v86_v34 = vadd.f32 %v267_v32, %v85_v33 }
  0x89   :  { %v88_v35 = vmax.f32 %v86_v34, 0.0 }
  0x8b   :  { %125 = vmatmul.f32.vlgmr.msra.gmra.mxu1 %v88_v35 }
 0x108   :  { %v126_v53 = vpop.f32.mrf.mxu1 }
 0x109   :  { %v127_v54 = vadd.f32 %v268_v52, %v126_v53 }
 0x10b   :  { %v129_v55 = vmax.f32 %v127_v54, 0.0 }
 0x10d   :  { %166 = vmatmul.f32.vlgmr.msra.gmra.mxu2 %v129_v55 }
 0x190   :  { %v167_v1 = vpop.f32.mrf.mxu2 }
 0x191   :  { %v168_v2 = vadd.f32 %v269_v0, %v167_v1 }
 0x193   :  { %v170_v3 = vmax.f32 %v168_v2, 0.0 }
 0x195   :  { %207 = vmatmul.f32.vlgmr.msra.gmra.mxu3 %v170_v3 }
 0x218   :  { %v208_v8 = vpop.f32.mrf.mxu3 }
 0x219   :  { %v209_v9 = vadd.f32 %v270_v7, %v208_v8 }
 0x21b   :  { %v211_v10 = vmax.f32 %v209_v9, 0.0 }
 0x21d   :  { %263 = vmatmul.msk.f32.vlgmr.msrb.gmra.mxu0 %vm224_vm1, %v211_v10 }
 0x29a   :  { %v245_v12 = vpop.f32.mrf.mxu0 }
 0x29b   :  { %v246_v13 = vadd.f32 %v271_v11, %v245_v12 }
 0x29d   :  { %273 = vtanh.f32 %v246_v13 }
 0x2a3   :  { %v274_v15 = vpop.eup %273 }
 0x2a4   :  { %v250_v16 = vsub.f32 %v274_v15, %v246_v13 }
 0x2a6   :  { %v254_v17 = vmul.f32 %v272_v14, %v250_v16 }
 0x2a8   :  { %v255_v18 = vadd.f32 %v254_v17, %v246_v13 }
 0x2aa   :  { %256 = vst.msk [vmem:[%s536_s12] sm:$0xff] %vm64_vm0, %v255_v18 }
 0x2ab   :  { %261 = vsyncpa [#allocation3], 1 }

</bundles_post_ra>
